<compile_context>
chip_gen: v6e
topology: v6e:2x2x1
jax: 0.10.0
libtpu: 0.0.40
codegen_flags: <defaults>
</compile_context>

<pallas_src>
import jax
import jax.numpy as jnp
from jax import lax
from jax.experimental import pallas as pl
from jax.experimental.pallas import tpu as pltpu


def rnn_tagger_kernel(emb_ref, w_ih_ref, w_hh_ref, b_ref,
                      w_fc_ref, b_fc_ref, out_ref, xp_ref, hs_ref):
    """Single-program kernel: full-sequence RNN + fc + log_softmax.

    emb_ref : (T*B, E) f32 in VMEM, row index = t*B + b (time-major)
    w_ih_ref: (E, H), w_hh_ref: (H, H), b_ref: (1, H)   (b = b_ih + b_hh)
    w_fc_ref: (H, O_pad), b_fc_ref: (1, O_pad)          (lane-dense padded fc)
    out_ref : (T*B, O_pad) f32
    xp_ref  : (T, B, H) f32 VMEM scratch (hoisted input projection)
    hs_ref  : (T, B, H) f32 VMEM scratch (hidden states for hoisted fc)
    """
    T, B, H = xp_ref.shape

    # --- Hoisted input projection: one big MXU matmul, bias folded in once.
    xp_ref[...] = (
        jnp.dot(emb_ref[...], w_ih_ref[...],
                preferred_element_type=jnp.float32)
        + b_ref[...]
    ).reshape(T, B, H)

    # --- Recurrence: only h @ W_hh + tanh on the serial path; h stays in vregs.
    w_hh = w_hh_ref[...]                      # hoist weight load out of loop
    h = jnp.zeros((B, H), jnp.float32)
    for t in range(T):                        # static T -> fully unrolled
        h = jnp.tanh(xp_ref[t]
                     + jnp.dot(h, w_hh, preferred_element_type=jnp.float32))
        hs_ref[t] = h                         # store off the serial chain

    # TODO(synk): training-mode dropout (p=0.4) omitted; eval semantics (identity).

    # --- Hoisted fc + log_softmax over all (T*B) rows; single lane-dense store.
    logits = (jnp.dot(hs_ref[...].reshape(T * B, H), w_fc_ref[...],
                      preferred_element_type=jnp.float32)
              + b_fc_ref[...])
    m = jnp.max(logits, axis=-1, keepdims=True)
    lse = m + jnp.log(jnp.sum(jnp.exp(logits - m), axis=-1, keepdims=True))
    out_ref[...] = (logits - lse).astype(out_ref.dtype)


def aspect_term_extractor_forward(token_ids, params):
    """token_ids: (B, T) int32. Returns log-probs (B, T, O) float32."""
    B, T = token_ids.shape
    H = params["w_hh"].shape[0]
    O = params["w_fc"].shape[1]
    O_pad = ((O + 127) // 128) * 128

    # Embedding gather straight into time-major flattened layout (row = t*B + b):
    # avoids a separate HBM transpose/relayout of the embedded tensor.
    flat_ids = token_ids.T.reshape(-1)                              # (T*B,)
    emb_flat = jnp.take(params["embedding"], flat_ids,
                        axis=0).astype(jnp.float32)                 # (T*B, E)

    # Lane-dense fc: pad to O_pad output columns. Padded bias = -1e30 so padded
    # lanes contribute exp() == 0 to the softmax normalizer (exact for real lanes).
    w_fc_p = jnp.zeros((H, O_pad), jnp.float32).at[:, :O].set(
        params["w_fc"].astype(jnp.float32))
    b_fc_p = jnp.full((1, O_pad), -1e30, jnp.float32).at[:, :O].set(
        params["b_fc"].astype(jnp.float32))

    out_flat = pl.pallas_call(
        rnn_tagger_kernel,
        out_shape=jax.ShapeDtypeStruct((T * B, O_pad), jnp.float32),
        scratch_shapes=[pltpu.VMEM((T, B, H), jnp.float32),   # xp_ref
                        pltpu.VMEM((T, B, H), jnp.float32)],  # hs_ref
    )(emb_flat,
      params["w_ih"].astype(jnp.float32),
      params["w_hh"].astype(jnp.float32),
      params["b"].astype(jnp.float32),
      w_fc_p, b_fc_p)

    out = out_flat[:, :O].reshape(T, B, O)                          # (T, B, O)
    return jnp.transpose(out, (1, 0, 2))                            # (B, T, O)


def reference_forward(token_ids, params):
    """Pure-JAX reference matching PyTorch semantics (eval mode)."""
    embedded = jnp.take(params["embedding"], token_ids,
                        axis=0).astype(jnp.float32)                 # (B, T, E)
    B, T, _ = embedded.shape
    H = params["w_hh"].shape[0]

    def step(h, x_t):
        h_new = jnp.tanh(x_t @ params["w_ih"] + h @ params["w_hh"] + params["b"])
        return h_new, h_new

    _, hs = lax.scan(step, jnp.zeros((B, H), jnp.float32),
                     jnp.transpose(embedded, (1, 0, 2)))
    rnn_out = jnp.transpose(hs, (1, 0, 2))                          # (B, T, H)
    logits = rnn_out @ params["w_fc"] + params["b_fc"]
    return jax.nn.log_softmax(logits, axis=2)


def init_params(key, vocab_size, embedding_dim, hidden_dim, output_dim):
    ks = jax.random.split(key, 6)
    scale = 0.1
    return {
        "embedding": scale * jax.random.normal(ks[0], (vocab_size, embedding_dim), jnp.float32),
        "w_ih": scale * jax.random.normal(ks[1], (embedding_dim, hidden_dim), jnp.float32),
        "w_hh": scale * jax.random.normal(ks[2], (hidden_dim, hidden_dim), jnp.float32),
        "b": scale * jax.random.normal(ks[3], (1, hidden_dim), jnp.float32),
        "w_fc": scale * jax.random.normal(ks[4], (hidden_dim, output_dim), jnp.float32),
        "b_fc": scale * jax.random.normal(ks[5], (1, output_dim), jnp.float32),
    }


if __name__ == "__main__":
    vocab_size, embedding_dim, hidden_dim, output_dim = 50, 32, 32, 8
    batch, seq_len = 2, 8

    key = jax.random.PRNGKey(0)
    k_params, k_tokens = jax.random.split(key)
    params = init_params(k_params, vocab_size, embedding_dim, hidden_dim, output_dim)
    token_ids = jax.random.randint(k_tokens, (batch, seq_len), 0, vocab_size, jnp.int32)

    out = jax.block_until_ready(aspect_term_extractor_forward(token_ids, params))
    ref = jax.block_until_ready(reference_forward(token_ids, params))

    assert out.shape == (batch, seq_len, output_dim)
    assert jnp.allclose(out, ref, atol=1e-5, rtol=1e-5), "mismatch vs reference"
    print("KERNEL_OK")
</pallas_src>

<mosaic_0001>
module attributes {stable_mosaic.version = 11 : i64} {
  func.func @rnn_tagger_kernel(%arg0: memref<16x32xf32, #tpu.memory_space<vmem>>, %arg1: memref<32x32xf32, #tpu.memory_space<vmem>>, %arg2: memref<32x32xf32, #tpu.memory_space<vmem>>, %arg3: memref<1x32xf32, #tpu.memory_space<vmem>>, %arg4: memref<32x128xf32, #tpu.memory_space<vmem>>, %arg5: memref<1x128xf32, #tpu.memory_space<vmem>>, %arg6: memref<16x128xf32, #tpu.memory_space<vmem>>, %arg7: memref<8x2x32xf32, #tpu.memory_space<vmem>>, %arg8: memref<8x2x32xf32, #tpu.memory_space<vmem>>) attributes {dimension_semantics = [], scalar_prefetch = 0 : i64, scratch_operands = 2 : i64, tpu.core_type = #tpu.core_type<tc>} {
    %c0 = arith.constant 0 : index
    %c0_0 = arith.constant 0 : index
    %0 = vector.load %arg0[%c0, %c0_0] : memref<16x32xf32, #tpu.memory_space<vmem>>, vector<16x32xf32>
    %c0_1 = arith.constant 0 : index
    %c0_2 = arith.constant 0 : index
    %1 = vector.load %arg1[%c0_1, %c0_2] : memref<32x32xf32, #tpu.memory_space<vmem>>, vector<32x32xf32>
    %cst = arith.constant dense<0.000000e+00> : vector<16x32xf32>
    %2 = tpu.matmul %0, %1, %cst {dimension_numbers = #tpu.dot_dimension_numbers<[1], [0], [0], [1], [0, 0, 1, 1], [], []>} : vector<16x32xf32>, vector<32x32xf32>, vector<16x32xf32> -> vector<16x32xf32>
    %c0_3 = arith.constant 0 : index
    %c0_4 = arith.constant 0 : index
    %3 = vector.load %arg3[%c0_3, %c0_4] : memref<1x32xf32, #tpu.memory_space<vmem>>, vector<1x32xf32>
    %4 = vector.broadcast %3 : vector<1x32xf32> to vector<16x32xf32>
    %5 = arith.addf %2, %4 : vector<16x32xf32>
    %6 = vector.shape_cast %5 : vector<16x32xf32> to vector<8x2x32xf32>
    %c0_5 = arith.constant 0 : index
    %c0_6 = arith.constant 0 : index
    %c0_7 = arith.constant 0 : index
    %7 = vector.load %arg7[%c0_5, %c0_6, %c0_7] : memref<8x2x32xf32, #tpu.memory_space<vmem>>, vector<8x2x32xf32>
    tpu.vector_store %arg7[%c0_5, %c0_6, %c0_7], %6 {strides = array<i32>} : memref<8x2x32xf32, #tpu.memory_space<vmem>>, vector<8x2x32xf32>,
    %c0_8 = arith.constant 0 : index
    %c0_9 = arith.constant 0 : index
    %8 = vector.load %arg2[%c0_8, %c0_9] : memref<32x32xf32, #tpu.memory_space<vmem>>, vector<32x32xf32>
    %cst_10 = arith.constant 0.000000e+00 : f32
    %9 = vector.broadcast %cst_10 : f32 to vector<2x32xf32>
    %c0_11 = arith.constant 0 : index
    %c0_12 = arith.constant 0 : index
    %c0_13 = arith.constant 0 : index
    %10 = vector.load %arg7[%c0_11, %c0_12, %c0_13] : memref<8x2x32xf32, #tpu.memory_space<vmem>>, vector<1x2x32xf32>
    %11 = vector.shape_cast %10 : vector<1x2x32xf32> to vector<2x32xf32>
    %cst_14 = arith.constant dense<0.000000e+00> : vector<2x32xf32>
    %12 = tpu.matmul %9, %8, %cst_14 {dimension_numbers = #tpu.dot_dimension_numbers<[1], [0], [0], [1], [0, 0, 1, 1], [], []>} : vector<2x32xf32>, vector<32x32xf32>, vector<2x32xf32> -> vector<2x32xf32>
    %13 = arith.addf %11, %12 : vector<2x32xf32>
    %14 = math.tanh %13 : vector<2x32xf32>
    %c0_15 = arith.constant 0 : index
    %c0_16 = arith.constant 0 : index
    %c0_17 = arith.constant 0 : index
    %15 = vector.load %arg8[%c0_15, %c0_16, %c0_17] : memref<8x2x32xf32, #tpu.memory_space<vmem>>, vector<1x2x32xf32>
    %16 = vector.shape_cast %15 : vector<1x2x32xf32> to vector<2x32xf32>
    %17 = vector.shape_cast %14 : vector<2x32xf32> to vector<1x2x32xf32>
    tpu.vector_store %arg8[%c0_15, %c0_16, %c0_17], %17 {strides = array<i32>} : memref<8x2x32xf32, #tpu.memory_space<vmem>>, vector<1x2x32xf32>,
    %c1 = arith.constant 1 : index
    %c0_18 = arith.constant 0 : index
    %c0_19 = arith.constant 0 : index
    %18 = vector.load %arg7[%c1, %c0_18, %c0_19] : memref<8x2x32xf32, #tpu.memory_space<vmem>>, vector<1x2x32xf32>
    %19 = vector.shape_cast %18 : vector<1x2x32xf32> to vector<2x32xf32>
    %cst_20 = arith.constant dense<0.000000e+00> : vector<2x32xf32>
    %20 = tpu.matmul %14, %8, %cst_20 {dimension_numbers = #tpu.dot_dimension_numbers<[1], [0], [0], [1], [0, 0, 1, 1], [], []>} : vector<2x32xf32>, vector<32x32xf32>, vector<2x32xf32> -> vector<2x32xf32>
    %21 = arith.addf %19, %20 : vector<2x32xf32>
    %22 = math.tanh %21 : vector<2x32xf32>
    %c1_21 = arith.constant 1 : index
    %c0_22 = arith.constant 0 : index
    %c0_23 = arith.constant 0 : index
    %23 = vector.load %arg8[%c1_21, %c0_22, %c0_23] : memref<8x2x32xf32, #tpu.memory_space<vmem>>, vector<1x2x32xf32>
    %24 = vector.shape_cast %23 : vector<1x2x32xf32> to vector<2x32xf32>
    %25 = vector.shape_cast %22 : vector<2x32xf32> to vector<1x2x32xf32>
    tpu.vector_store %arg8[%c1_21, %c0_22, %c0_23], %25 {strides = array<i32>} : memref<8x2x32xf32, #tpu.memory_space<vmem>>, vector<1x2x32xf32>,
    %c2 = arith.constant 2 : index
    %c0_24 = arith.constant 0 : index
    %c0_25 = arith.constant 0 : index
    %26 = vector.load %arg7[%c2, %c0_24, %c0_25] : memref<8x2x32xf32, #tpu.memory_space<vmem>>, vector<1x2x32xf32>
    %27 = vector.shape_cast %26 : vector<1x2x32xf32> to vector<2x32xf32>
    %cst_26 = arith.constant dense<0.000000e+00> : vector<2x32xf32>
    %28 = tpu.matmul %22, %8, %cst_26 {dimension_numbers = #tpu.dot_dimension_numbers<[1], [0], [0], [1], [0, 0, 1, 1], [], []>} : vector<2x32xf32>, vector<32x32xf32>, vector<2x32xf32> -> vector<2x32xf32>
    %29 = arith.addf %27, %28 : vector<2x32xf32>
    %30 = math.tanh %29 : vector<2x32xf32>
    %c2_27 = arith.constant 2 : index
    %c0_28 = arith.constant 0 : index
    %c0_29 = arith.constant 0 : index
    %31 = vector.load %arg8[%c2_27, %c0_28, %c0_29] : memref<8x2x32xf32, #tpu.memory_space<vmem>>, vector<1x2x32xf32>
    %32 = vector.shape_cast %31 : vector<1x2x32xf32> to vector<2x32xf32>
    %33 = vector.shape_cast %30 : vector<2x32xf32> to vector<1x2x32xf32>
    tpu.vector_store %arg8[%c2_27, %c0_28, %c0_29], %33 {strides = array<i32>} : memref<8x2x32xf32, #tpu.memory_space<vmem>>, vector<1x2x32xf32>,
    %c3 = arith.constant 3 : index
    %c0_30 = arith.constant 0 : index
    %c0_31 = arith.constant 0 : index
    %34 = vector.load %arg7[%c3, %c0_30, %c0_31] : memref<8x2x32xf32, #tpu.memory_space<vmem>>, vector<1x2x32xf32>
    %35 = vector.shape_cast %34 : vector<1x2x32xf32> to vector<2x32xf32>
    %cst_32 = arith.constant dense<0.000000e+00> : vector<2x32xf32>
    %36 = tpu.matmul %30, %8, %cst_32 {dimension_numbers = #tpu.dot_dimension_numbers<[1], [0], [0], [1], [0, 0, 1, 1], [], []>} : vector<2x32xf32>, vector<32x32xf32>, vector<2x32xf32> -> vector<2x32xf32>
    %37 = arith.addf %35, %36 : vector<2x32xf32>
    %38 = math.tanh %37 : vector<2x32xf32>
    %c3_33 = arith.constant 3 : index
    %c0_34 = arith.constant 0 : index
    %c0_35 = arith.constant 0 : index
    %39 = vector.load %arg8[%c3_33, %c0_34, %c0_35] : memref<8x2x32xf32, #tpu.memory_space<vmem>>, vector<1x2x32xf32>
    %40 = vector.shape_cast %39 : vector<1x2x32xf32> to vector<2x32xf32>
    %41 = vector.shape_cast %38 : vector<2x32xf32> to vector<1x2x32xf32>
    tpu.vector_store %arg8[%c3_33, %c0_34, %c0_35], %41 {strides = array<i32>} : memref<8x2x32xf32, #tpu.memory_space<vmem>>, vector<1x2x32xf32>,
    %c4 = arith.constant 4 : index
    %c0_36 = arith.constant 0 : index
    %c0_37 = arith.constant 0 : index
    %42 = vector.load %arg7[%c4, %c0_36, %c0_37] : memref<8x2x32xf32, #tpu.memory_space<vmem>>, vector<1x2x32xf32>
    %43 = vector.shape_cast %42 : vector<1x2x32xf32> to vector<2x32xf32>
    %cst_38 = arith.constant dense<0.000000e+00> : vector<2x32xf32>
    %44 = tpu.matmul %38, %8, %cst_38 {dimension_numbers = #tpu.dot_dimension_numbers<[1], [0], [0], [1], [0, 0, 1, 1], [], []>} : vector<2x32xf32>, vector<32x32xf32>, vector<2x32xf32> -> vector<2x32xf32>
    %45 = arith.addf %43, %44 : vector<2x32xf32>
    %46 = math.tanh %45 : vector<2x32xf32>
    %c4_39 = arith.constant 4 : index
    %c0_40 = arith.constant 0 : index
    %c0_41 = arith.constant 0 : index
    %47 = vector.load %arg8[%c4_39, %c0_40, %c0_41] : memref<8x2x32xf32, #tpu.memory_space<vmem>>, vector<1x2x32xf32>
    %48 = vector.shape_cast %47 : vector<1x2x32xf32> to vector<2x32xf32>
    %49 = vector.shape_cast %46 : vector<2x32xf32> to vector<1x2x32xf32>
    tpu.vector_store %arg8[%c4_39, %c0_40, %c0_41], %49 {strides = array<i32>} : memref<8x2x32xf32, #tpu.memory_space<vmem>>, vector<1x2x32xf32>,
    %c5 = arith.constant 5 : index
    %c0_42 = arith.constant 0 : index
    %c0_43 = arith.constant 0 : index
    %50 = vector.load %arg7[%c5, %c0_42, %c0_43] : memref<8x2x32xf32, #tpu.memory_space<vmem>>, vector<1x2x32xf32>
    %51 = vector.shape_cast %50 : vector<1x2x32xf32> to vector<2x32xf32>
    %cst_44 = arith.constant dense<0.000000e+00> : vector<2x32xf32>
    %52 = tpu.matmul %46, %8, %cst_44 {dimension_numbers = #tpu.dot_dimension_numbers<[1], [0], [0], [1], [0, 0, 1, 1], [], []>} : vector<2x32xf32>, vector<32x32xf32>, vector<2x32xf32> -> vector<2x32xf32>
    %53 = arith.addf %51, %52 : vector<2x32xf32>
    %54 = math.tanh %53 : vector<2x32xf32>
    %c5_45 = arith.constant 5 : index
    %c0_46 = arith.constant 0 : index
    %c0_47 = arith.constant 0 : index
    %55 = vector.load %arg8[%c5_45, %c0_46, %c0_47] : memref<8x2x32xf32, #tpu.memory_space<vmem>>, vector<1x2x32xf32>
    %56 = vector.shape_cast %55 : vector<1x2x32xf32> to vector<2x32xf32>
    %57 = vector.shape_cast %54 : vector<2x32xf32> to vector<1x2x32xf32>
    tpu.vector_store %arg8[%c5_45, %c0_46, %c0_47], %57 {strides = array<i32>} : memref<8x2x32xf32, #tpu.memory_space<vmem>>, vector<1x2x32xf32>,
    %c6 = arith.constant 6 : index
    %c0_48 = arith.constant 0 : index
    %c0_49 = arith.constant 0 : index
    %58 = vector.load %arg7[%c6, %c0_48, %c0_49] : memref<8x2x32xf32, #tpu.memory_space<vmem>>, vector<1x2x32xf32>
    %59 = vector.shape_cast %58 : vector<1x2x32xf32> to vector<2x32xf32>
    %cst_50 = arith.constant dense<0.000000e+00> : vector<2x32xf32>
    %60 = tpu.matmul %54, %8, %cst_50 {dimension_numbers = #tpu.dot_dimension_numbers<[1], [0], [0], [1], [0, 0, 1, 1], [], []>} : vector<2x32xf32>, vector<32x32xf32>, vector<2x32xf32> -> vector<2x32xf32>
    %61 = arith.addf %59, %60 : vector<2x32xf32>
    %62 = math.tanh %61 : vector<2x32xf32>
    %c6_51 = arith.constant 6 : index
    %c0_52 = arith.constant 0 : index
    %c0_53 = arith.constant 0 : index
    %63 = vector.load %arg8[%c6_51, %c0_52, %c0_53] : memref<8x2x32xf32, #tpu.memory_space<vmem>>, vector<1x2x32xf32>
    %64 = vector.shape_cast %63 : vector<1x2x32xf32> to vector<2x32xf32>
    %65 = vector.shape_cast %62 : vector<2x32xf32> to vector<1x2x32xf32>
    tpu.vector_store %arg8[%c6_51, %c0_52, %c0_53], %65 {strides = array<i32>} : memref<8x2x32xf32, #tpu.memory_space<vmem>>, vector<1x2x32xf32>,
    %c7 = arith.constant 7 : index
    %c0_54 = arith.constant 0 : index
    %c0_55 = arith.constant 0 : index
    %66 = vector.load %arg7[%c7, %c0_54, %c0_55] : memref<8x2x32xf32, #tpu.memory_space<vmem>>, vector<1x2x32xf32>
    %67 = vector.shape_cast %66 : vector<1x2x32xf32> to vector<2x32xf32>
    %cst_56 = arith.constant dense<0.000000e+00> : vector<2x32xf32>
    %68 = tpu.matmul %62, %8, %cst_56 {dimension_numbers = #tpu.dot_dimension_numbers<[1], [0], [0], [1], [0, 0, 1, 1], [], []>} : vector<2x32xf32>, vector<32x32xf32>, vector<2x32xf32> -> vector<2x32xf32>
    %69 = arith.addf %67, %68 : vector<2x32xf32>
    %70 = math.tanh %69 : vector<2x32xf32>
    %c7_57 = arith.constant 7 : index
    %c0_58 = arith.constant 0 : index
    %c0_59 = arith.constant 0 : index
    %71 = vector.load %arg8[%c7_57, %c0_58, %c0_59] : memref<8x2x32xf32, #tpu.memory_space<vmem>>, vector<1x2x32xf32>
    %72 = vector.shape_cast %71 : vector<1x2x32xf32> to vector<2x32xf32>
    %73 = vector.shape_cast %70 : vector<2x32xf32> to vector<1x2x32xf32>
    tpu.vector_store %arg8[%c7_57, %c0_58, %c0_59], %73 {strides = array<i32>} : memref<8x2x32xf32, #tpu.memory_space<vmem>>, vector<1x2x32xf32>,
    %c0_60 = arith.constant 0 : index
    %c0_61 = arith.constant 0 : index
    %c0_62 = arith.constant 0 : index
    %74 = vector.load %arg8[%c0_60, %c0_61, %c0_62] : memref<8x2x32xf32, #tpu.memory_space<vmem>>, vector<8x2x32xf32>
    %75 = vector.shape_cast %74 : vector<8x2x32xf32> to vector<16x32xf32>
    %c0_63 = arith.constant 0 : index
    %c0_64 = arith.constant 0 : index
    %76 = vector.load %arg4[%c0_63, %c0_64] : memref<32x128xf32, #tpu.memory_space<vmem>>, vector<32x128xf32>
    %cst_65 = arith.constant dense<0.000000e+00> : vector<16x128xf32>
    %77 = tpu.matmul %75, %76, %cst_65 {dimension_numbers = #tpu.dot_dimension_numbers<[1], [0], [0], [1], [0, 0, 1, 1], [], []>} : vector<16x32xf32>, vector<32x128xf32>, vector<16x128xf32> -> vector<16x128xf32>
    %c0_66 = arith.constant 0 : index
    %c0_67 = arith.constant 0 : index
    %78 = vector.load %arg5[%c0_66, %c0_67] : memref<1x128xf32, #tpu.memory_space<vmem>>, vector<1x128xf32>
    %79 = vector.broadcast %78 : vector<1x128xf32> to vector<16x128xf32>
    %80 = arith.addf %77, %79 : vector<16x128xf32>
    %cst_68 = arith.constant dense<0xFF800000> : vector<16xf32>
    %81 = vector.multi_reduction <maximumf>, %80, %cst_68 [1] : vector<16x128xf32> to vector<16xf32>
    %82 = vector.shape_cast %81 : vector<16xf32> to vector<16x1xf32>
    %83 = vector.broadcast %82 : vector<16x1xf32> to vector<16x128xf32>
    %84 = arith.subf %80, %83 : vector<16x128xf32>
    %85 = math.exp %84 : vector<16x128xf32>
    %cst_69 = arith.constant dense<0.000000e+00> : vector<16xf32>
    %86 = vector.multi_reduction <add>, %85, %cst_69 [1] : vector<16x128xf32> to vector<16xf32>
    %87 = vector.shape_cast %86 : vector<16xf32> to vector<16x1xf32>
    %88 = math.log %87 : vector<16x1xf32>
    %89 = arith.addf %82, %88 : vector<16x1xf32>
    %90 = vector.broadcast %89 : vector<16x1xf32> to vector<16x128xf32>
    %91 = arith.subf %80, %90 : vector<16x128xf32>
    %c0_70 = arith.constant 0 : index
    %c0_71 = arith.constant 0 : index
    %92 = vector.load %arg6[%c0_70, %c0_71] : memref<16x128xf32, #tpu.memory_space<vmem>>, vector<16x128xf32>
    tpu.vector_store %arg6[%c0_70, %c0_71], %91 {strides = array<i32>} : memref<16x128xf32, #tpu.memory_space<vmem>>, vector<16x128xf32>,
    return
  }
}

</mosaic_0001>

<bundles_post_ra>
// kernel: tpu_custom_call.1
= control target key start
LH: loop header
LB: loop body
LE: loop exit
PB: predicated region body
PF: predicated region fallthrough
CT: control target
= control target key end

     0   :  { %11 = vsyncpa [#allocation5], 0  ;;  %s1568_s0 = inlined_call_operand.hbm [shape: f32[16,32], index: 0, kind: input, shape index: {}]   ;;  %s1569_s1 = inlined_call_operand.hbm [shape: f32[32,32], index: 1, kind: input, shape index: {}]   ;;  %s1570_s2 = inlined_call_operand.hbm [shape: f32[32,32], index: 2, kind: input, shape index: {}]   ;;  %s1571_s3 = inlined_call_operand.vmem [shape: f32[1,32], index: 3, kind: input, shape index: {}]   ;;  %s1572_s4 = inlined_call_operand.hbm [shape: f32[32,128], index: 4, kind: input, shape index: {}]   ;;  %s1573_s5 = inlined_call_operand.vmem [shape: f32[1,128], index: 5, kind: input, shape index: {}]   ;;  %s1574_s6 = inlined_call_operand.hbm [shape: f32[16,128], index: 6, kind: output, shape index: {}]  }
   0x1   :  { %12 = vsyncpa [#allocation8], 0 }
   0x2   :  { %13 = vsyncpa [#allocation11], 0 }
   0x3   :  { %14 = vsyncpa [#allocation6], 0  ;;  %s1361_s21 = smov [#allocation7]   ;;  %s1362_s23 = smov [#allocation4]  }
   0x4   :  { %s32_s22 = sshll.u32 %s1361_s21, 4  ;;  %s20_s24 = sshll.u32 %s1362_s23, 4  ;;  %s33_s22 = int_to_ptr.vmem [resolvable:$true] %s32_s22  ;;  %s21_s24 = int_to_ptr.vmem [resolvable:$true] %s20_s24 }
   0x5   :  { %s1261_s25 = scalar_lea.vmem %s33_s22, 512  ;;  %p1266_p1 = scmp.lt.s32.totalorder %s33_s22, %s33_s22 }
   0x6   :  { %p1262_p0 = scmp.ne.s32.totalorder %s33_s22, %s1261_s25  ;;  %p1267_p2 = scmp.lt.s32.totalorder %s1261_s25, %s1261_s25 }
   0x8   :  { %p1268_p3 = por %p1267_p2, %p1266_p1 }
   0xa   :  { %p1269_p4 = pnand %p1268_p3, %p1262_p0 }
   0xc   :  { %1272 = shalt.err (!%p1269_p4)
}
   0xd   :  { %s1363_s26 = smov 128   ;;  %s1364_s27 = smov 8  }
   0xe   :  { %38 = dma.hbm_to_vmem [thread:$0]  %s1569_s1, 512, %s33_s22, [#allocation8], %s1363_s26, %s1363_s26, %s1364_s27  }
   0xf   :  { %s1281_s30 = scalar_lea.vmem %s21_s24, 256  ;;  %p1286_p6 = scmp.lt.s32.totalorder %s21_s24, %s21_s24 }
  0x10   :  { %p1282_p5 = scmp.ne.s32.totalorder %s21_s24, %s1281_s30  ;;  %p1287_p7 = scmp.lt.s32.totalorder %s1281_s30, %s1281_s30 }
  0x12   :  { %p1288_p8 = por %p1287_p7, %p1286_p6 }
  0x14   :  { %p1289_p9 = pnand %p1288_p8, %p1282_p5 }
  0x16   :  { %1292 = shalt.err (!%p1289_p9)
}
  0x17   :  { %26 = dma.hbm_to_vmem [thread:$0]  %s1568_s0, 256, %s21_s24, [#allocation5], %s1363_s26, %s1363_s26, %s1364_s27  }
  0x18   :  { %s1365_s9 = smov [#allocation9]   ;;  %s1366_s11 = smov [#allocation10]  }
  0x19   :  { %s44_s10 = sshll.u32 %s1365_s9, 4  ;;  %s58_s12 = sshll.u32 %s1366_s11, 4  ;;  %s45_s10 = int_to_ptr.vmem [resolvable:$true] %s44_s10  ;;  %s59_s12 = int_to_ptr.vmem [resolvable:$true] %s58_s12 }
  0x1a   :  { %s1301_s1 = scalar_lea.vmem %s45_s10, 512  ;;  %p1306_p11 = scmp.lt.s32.totalorder %s45_s10, %s45_s10 }
  0x1b   :  { %p1302_p10 = scmp.ne.s32.totalorder %s45_s10, %s1301_s1  ;;  %p1307_p12 = scmp.lt.s32.totalorder %s1301_s1, %s1301_s1 }
  0x1d   :  { %p1308_p13 = por %p1307_p12, %p1306_p11 }
  0x1f   :  { %p1309_p0 = pnand %p1308_p13, %p1302_p10 }
  0x21   :  { %1312 = shalt.err (!%p1309_p0)
}
  0x22   :  { %50 = dma.hbm_to_vmem [thread:$0]  %s1570_s2, 512, %s45_s10, [#allocation8], %s1363_s26, %s1363_s26, %s1364_s27  }
  0x23   :  { %s1321_s0 = scalar_lea.vmem %s59_s12, 512  ;;  %p1326_p2 = scmp.lt.s32.totalorder %s59_s12, %s59_s12 }
  0x24   :  { %p1322_p1 = scmp.ne.s32.totalorder %s59_s12, %s1321_s0  ;;  %p1327_p3 = scmp.lt.s32.totalorder %s1321_s0, %s1321_s0 }
  0x26   :  { %p1328_p4 = por %p1327_p3, %p1326_p2 }
  0x28   :  { %p1329_p5 = pnand %p1328_p4, %p1322_p1 }
  0x2a   :  { %1332 = shalt.err (!%p1329_p5)
}
  0x2b   :  { %64 = dma.hbm_to_vmem [thread:$0]  %s1572_s4, 512, %s59_s12, [#allocation11], %s1363_s26, %s1363_s26, %s1364_s27  }
  0x2c   :  { %1353 = dma.done.wait [#allocation5], 256  }
  0x2d   :  { %1354 = vsyncadd [#allocation5], 4294967040 }
  0x2e   :  { %1355 = dma.done.wait [#allocation8], 1024  }
  0x2f   :  { %1356 = vsyncadd [#allocation8], 4294966272 }
  0x30   :  { %1357 = dma.done.wait [#allocation11], 512  }
  0x31   :  { %1358 = vsyncadd [#allocation11], 4294966784  ;;  %v1367_v0 = vmov 0.0   ;;  %vm1368_vm0 = vmmov 0   ;;  %vm92_vm1 = vcmask 261120   ;;  %v84_v1 = vld [vmem:[#allocation7 + $0x18] sm:$0xff]  ;;  %v180_v13 = vlaneseq }
  0x32   :  { %1120 = vmatprep.subr.mxu1 %v1367_v0  ;;  %1128 = vmatprep.mubr.msk.f32.mxu1 %vm1368_vm0, %v1367_v0  ;;  %v83_v2 = vld [vmem:[#allocation7 + $0x10] sm:$0xff]  ;;  %v82_v4 = vld [vmem:[#allocation7 + $0x8] sm:$0xff]  ;;  %v1434_v5 = vld [vmem:[#allocation9 + $0x18] sm:$0xff]  ;;  %v1369_v11 = vmov 1983009808   ;;  %vm218_vm2 = vcmask 254976  }
  0x33   :  { %1109 = vmatprep.subr.mxu0 %v84_v1  ;;  %v79_v3 = vld [vmem:[#allocation4] sm:$0xff]  ;;  %1121 = vmatpush3.msra.mxu1 %v1434_v5  ;;  %v81_v7 = vld [vmem:[#allocation7] sm:$0xff]  ;;  %v1440_v8 = vld [vmem:[#allocation9 + $0x8] sm:$0xff]  ;;  %v178_v12 = vunpack.c.l.s4 %v1369_v11  ;;  %v181_v15 = vshrl.u32 %v180_v13, 7 }
  0x34   :  { %1110 = vmatpush3.msra.mxu0 %v84_v1  ;;  %1117 = vmatprep.mubr.msk.f32.mxu0 %vm92_vm1, %v79_v3  ;;  %v1436_v6 = vld [vmem:[#allocation9 + $0x10] sm:$0xff]  ;;  %v80_v9 = vld [vmem:[#allocation4 + $0x8] sm:$0xff]  ;;  %v1444_v10 = vld [vmem:[#allocation9] sm:$0xff] }
  0x35   :  { %1111 = vmatprep.subr.mxu0 %v83_v2  ;;  %1122 = vmatprep.subr.mxu1 %v1367_v0  ;;  %v179_v14 = vunpack.c.0.s8 %v178_v12  ;;  %v1044_v16 = vld [vmem:[%s1571_s3] ss:$0 sm:$0xff]  ;;  %v872_v12 = vld [vmem:[#allocation10 + $0x18] sm:$0xff] }
  0x36   :  { %1112 = vmatpush3.msra.mxu0 %v83_v2  ;;  %1123 = vmatpush3.msra.mxu1 %v1436_v6  ;;  %v871_v13 = vld [vmem:[#allocation10 + $0x10] sm:$0xff] }
  0x37   :  { %1113 = vmatprep.subr.mxu0 %v82_v4  ;;  %1124 = vmatprep.subr.mxu1 %v1367_v0  ;;  %v1476_v17 = vsub.s32 %v179_v14, %v181_v15  ;;  %v870_v14 = vld [vmem:[#allocation10 + $0x8] sm:$0xff]  ;;  %v869_v15 = vld [vmem:[#allocation10] sm:$0xff] }
  0x38   :  { %1114 = vmatpush3.msra.mxu0 %v82_v4  ;;  %1125 = vmatpush3.msra.mxu1 %v1440_v8 }
  0x39   :  { %1115 = vmatprep.subr.mxu0 %v81_v7  ;;  %1126 = vmatprep.subr.mxu1 %v1367_v0 }
  0x3a   :  { %1116 = vmatpush3.msra.mxu0 %v81_v7  ;;  %1127 = vmatpush3.msra.mxu1 %v1444_v10 }
  0x3b   :  { %1118 = vmatmul.mubr.msk.f32.vlgmr.msra.gmra.mxu0 %vm92_vm1, %v80_v9  ;;  %1129 = vmatmul.mubr.f32.vlgmr.msra.gmra.mxu1 %v1367_v0 }
  0x3c   :  { %1131 = vmatprep.subr.mxu0 %v1367_v0  ;;  %1139 = vmatprep.mubr.msk.f32.mxu0 %vm1368_vm0, %v1367_v0 }
  0x3d   :  { %1132 = vmatpush3.msra.mxu0 %v1434_v5  ;;  %1142 = vmatprep.subr.mxu1 %v1367_v0 }
  0x3e   :  { %1133 = vmatprep.subr.mxu0 %v1367_v0  ;;  %1143 = vmatpush3.msra.mxu1 %v1434_v5 }
  0x3f   :  { %1134 = vmatpush3.msra.mxu0 %v1436_v6  ;;  %1144 = vmatprep.subr.mxu1 %v1367_v0 }
  0x40   :  { %1135 = vmatprep.subr.mxu0 %v1367_v0  ;;  %1145 = vmatpush3.msra.mxu1 %v1436_v6 }
  0x41   :  { %1136 = vmatpush3.msra.mxu0 %v1440_v8  ;;  %1146 = vmatprep.subr.mxu1 %v1367_v0 }
  0x42   :  { %1137 = vmatprep.subr.mxu0 %v1367_v0  ;;  %1147 = vmatpush3.msra.mxu1 %v1440_v8 }
  0x43   :  { %1138 = vmatpush3.msra.mxu0 %v1444_v10  ;;  %1148 = vmatprep.subr.mxu1 %v1367_v0 }
  0x44   :  { %1150 = vmatprep.mubr.msk.f32.mxu1 %vm1368_vm0, %v1367_v0  ;;  %1149 = vmatpush3.msra.mxu1 %v1444_v10 }
  0x45   :  { %1153 = vmatprep.subr.mxu0 %v1367_v0  ;;  %1164 = vmatprep.subr.mxu1 %v1367_v0 }
  0xfb   :  { %v1119_v18 = vpop.f32.mrf.mxu0  ;;  %v301_v20 = vpop.f32.mrf.mxu1 }
  0xfc   :  { %v171_v19 = vadd.f32 %v1119_v18, %v1044_v16 }
  0xfd   :  { %v165_v21 = vpop.f32.mrf.mxu0  ;;  %v1130_v25 = vpop.f32.mrf.mxu1 }
  0xfe   :  { %v193_v22 = vcombine.high %v171_v19, %v171_v19  ;;  %v200_v23 = vrot.slane %v171_v19, %v1476_v17  ;;  %v166_v24 = vadd.f32 %v1044_v16, %v165_v21 }
 0x100   :  { %v207_v26 = vrot.slane %v193_v22, %v1476_v17  ;;  %v208_v27 = vcombine.high %v200_v23, %v200_v23  ;;  %223 = vst.msk [vmem:[#allocation2 + $0x8] sm:$0x3] %vm218_vm2, %v200_v23  ;;  %v176_v28 = vcombine.high %v166_v24, %v166_v24  ;;  %v183_v29 = vrot.slane %v166_v24, %v1476_v17 }
 0x102   :  { %v209_v30 = vcombine.high %v207_v26, %v207_v26  ;;  %224 = vst.msk [vmem:[#allocation2 + $0xa] sm:$0x3] %vm218_vm2, %v208_v27  ;;  %225 = vst.msk [vmem:[#allocation2 + $0xc] sm:$0x3] %vm218_vm2, %v207_v26  ;;  %v190_v31 = vrot.slane %v176_v28, %v1476_v17  ;;  %v191_v32 = vcombine.high %v183_v29, %v183_v29 }
 0x103   :  { %219 = vst.msk [vmem:[#allocation2] sm:$0x3] %vm218_vm2, %v183_v29 }
 0x104   :  { %226 = vst.msk [vmem:[#allocation2 + $0xe] sm:$0x3] %vm218_vm2, %v209_v30  ;;  %v192_v33 = vcombine.high %v190_v31, %v190_v31  ;;  %220 = vst.msk [vmem:[#allocation2 + $0x2] sm:$0x3] %vm218_vm2, %v191_v32  ;;  %v1054_v32 = vld [vmem:[%s1573_s5] ss:$0 sm:$0xff] }
 0x105   :  { %221 = vst.msk [vmem:[#allocation2 + $0x4] sm:$0x3] %vm218_vm2, %v190_v31  ;;  %s1370_s5 = smov [#allocation12]  }
 0x106   :  { %222 = vst.msk [vmem:[#allocation2 + $0x6] sm:$0x3] %vm218_vm2, %v192_v33  ;;  %s1030_s18 = sshll.u32 %s1370_s5, 4  ;;  %s1031_s18 = int_to_ptr.vmem [resolvable:$true] %s1030_s18 }
 0x107   :  { %v546_v52 = vld [vmem:[#allocation2 + $0x8] sm:$0x3]  ;;  %s1333_s19 = scalar_lea.vmem %s1031_s18, 256  ;;  %p1338_p7 = scmp.lt.s32.totalorder %s1031_s18, %s1031_s18 }
 0x108   :  { %p1334_p6 = scmp.ne.s32.totalorder %s1031_s18, %s1333_s19  ;;  %p1339_p8 = scmp.lt.s32.totalorder %s1333_s19, %s1333_s19 }
 0x109   :  { %v625_v57 = vld [vmem:[#allocation2 + $0xa] sm:$0x3] }
 0x10a   :  { %v231_v34 = vld [vmem:[#allocation2] sm:$0x3]  ;;  %p1340_p9 = por %p1339_p8, %p1338_p7 }
 0x10b   :  { %v305_v35 = vadd.f32 %v301_v20, %v231_v34  ;;  %v309_v37 = vld [vmem:[#allocation2 + $0x2] sm:$0x3]  ;;  %v783_v16 = vld [vmem:[#allocation2 + $0xe] sm:$0x3] }
 0x10c   :  { %v388_v42 = vld [vmem:[#allocation2 + $0x4] sm:$0x3]  ;;  %p1341_p10 = pnand %p1340_p9, %p1334_p6 }
 0x10d   :  { %1229 = vtanh.f32 %v305_v35  ;;  %v467_v47 = vld [vmem:[#allocation2 + $0x6] sm:$0x3] }
 0x11a   :  { %v1230_v36 = vpop.eup %1229 }
 0x11b   :  { %307 = vst.msk [vmem:[#allocation3] sm:$0x3] %vm218_vm2, %v1230_v36  ;;  %1140 = vmatmul.mubr.msk.f32.vlgmr.msra.gmra.mxu0 %vm92_vm1, %v1230_v36 }
 0x11c   :  { %1154 = vmatpush3.msra.mxu0 %v1434_v5  ;;  %1161 = vmatprep.mubr.msk.f32.mxu0 %vm1368_vm0, %v1367_v0 }
 0x11d   :  { %1155 = vmatprep.subr.mxu0 %v1367_v0 }
 0x11e   :  { %1156 = vmatpush3.msra.mxu0 %v1436_v6 }
 0x11f   :  { %1157 = vmatprep.subr.mxu0 %v1367_v0 }
 0x120   :  { %1158 = vmatpush3.msra.mxu0 %v1440_v8 }
 0x121   :  { %1159 = vmatprep.subr.mxu0 %v1367_v0 }
 0x122   :  { %1160 = vmatpush3.msra.mxu0 %v1444_v10  ;;  %v861_v2 = vld [vmem:[#allocation3] sm:$0x3] }
 0x123   :  { %1175 = vmatprep.subr.mxu0 %v1367_v0 }
 0x1db   :  { %v379_v38 = vpop.f32.mrf.mxu0 }
 0x1dc   :  { %v383_v39 = vadd.f32 %v379_v38, %v309_v37 }
 0x1dd   :  { %v1141_v40 = vpop.f32.mrf.mxu0 }
 0x1de   :  { %1231 = vtanh.f32 %v383_v39 }
 0x1eb   :  { %v1232_v41 = vpop.eup %1231 }
 0x1ec   :  { %386 = vst.msk [vmem:[#allocation3 + $0x2] sm:$0x3] %vm218_vm2, %v1232_v41  ;;  %1151 = vmatmul.mubr.msk.f32.vlgmr.msra.gmra.mxu1 %vm92_vm1, %v1232_v41 }
 0x1ed   :  { %1165 = vmatpush3.msra.mxu1 %v1434_v5  ;;  %1172 = vmatprep.mubr.msk.f32.mxu1 %vm1368_vm0, %v1367_v0 }
 0x1ee   :  { %1166 = vmatprep.subr.mxu1 %v1367_v0 }
 0x1ef   :  { %1167 = vmatpush3.msra.mxu1 %v1436_v6 }
 0x1f0   :  { %1168 = vmatprep.subr.mxu1 %v1367_v0 }
 0x1f1   :  { %1169 = vmatpush3.msra.mxu1 %v1440_v8 }
 0x1f2   :  { %1170 = vmatprep.subr.mxu1 %v1367_v0 }
 0x1f3   :  { %1171 = vmatpush3.msra.mxu1 %v1444_v10  ;;  %v862_v62 = vld [vmem:[#allocation3 + $0x2] sm:$0x3] }
 0x1f4   :  { %1186 = vmatprep.subr.mxu1 %v1367_v0  ;;  %v888_v3 = vcombine.low %v861_v2, %v862_v62 }
 0x2ac   :  { %v458_v43 = vpop.f32.mrf.mxu1 }
 0x2ad   :  { %v462_v44 = vadd.f32 %v458_v43, %v388_v42 }
 0x2ae   :  { %v1152_v45 = vpop.f32.mrf.mxu1 }
 0x2af   :  { %1233 = vtanh.f32 %v462_v44 }
 0x2bc   :  { %v1234_v46 = vpop.eup %1233 }
 0x2bd   :  { %465 = vst.msk [vmem:[#allocation3 + $0x4] sm:$0x3] %vm218_vm2, %v1234_v46  ;;  %1162 = vmatmul.mubr.msk.f32.vlgmr.msra.gmra.mxu0 %vm92_vm1, %v1234_v46 }
 0x2be   :  { %1176 = vmatpush3.msra.mxu0 %v1434_v5  ;;  %1183 = vmatprep.mubr.msk.f32.mxu0 %vm1368_vm0, %v1367_v0 }
 0x2bf   :  { %1177 = vmatprep.subr.mxu0 %v1367_v0 }
 0x2c0   :  { %1178 = vmatpush3.msra.mxu0 %v1436_v6 }
 0x2c1   :  { %1179 = vmatprep.subr.mxu0 %v1367_v0 }
 0x2c2   :  { %1180 = vmatpush3.msra.mxu0 %v1440_v8 }
 0x2c3   :  { %1181 = vmatprep.subr.mxu0 %v1367_v0 }
 0x2c4   :  { %1182 = vmatpush3.msra.mxu0 %v1444_v10  ;;  %v863_v63 = vld [vmem:[#allocation3 + $0x4] sm:$0x3] }
 0x2c5   :  { %1197 = vmatprep.subr.mxu0 %v1367_v0 }
 0x37d   :  { %v537_v48 = vpop.f32.mrf.mxu0 }
 0x37e   :  { %v541_v49 = vadd.f32 %v537_v48, %v467_v47 }
 0x37f   :  { %v1163_v50 = vpop.f32.mrf.mxu0 }
 0x380   :  { %1235 = vtanh.f32 %v541_v49 }
 0x38d   :  { %v1236_v51 = vpop.eup %1235 }
 0x38e   :  { %544 = vst.msk [vmem:[#allocation3 + $0x6] sm:$0x3] %vm218_vm2, %v1236_v51  ;;  %1173 = vmatmul.mubr.msk.f32.vlgmr.msra.gmra.mxu1 %vm92_vm1, %v1236_v51 }
 0x38f   :  { %1187 = vmatpush3.msra.mxu1 %v1434_v5  ;;  %1194 = vmatprep.mubr.msk.f32.mxu1 %vm1368_vm0, %v1367_v0 }
 0x390   :  { %1188 = vmatprep.subr.mxu1 %v1367_v0 }
 0x391   :  { %1189 = vmatpush3.msra.mxu1 %v1436_v6 }
 0x392   :  { %1190 = vmatprep.subr.mxu1 %v1367_v0 }
 0x393   :  { %1191 = vmatpush3.msra.mxu1 %v1440_v8 }
 0x394   :  { %1192 = vmatprep.subr.mxu1 %v1367_v0 }
 0x395   :  { %1193 = vmatpush3.msra.mxu1 %v1444_v10  ;;  %v864_v61 = vld [vmem:[#allocation3 + $0x6] sm:$0x3] }
 0x396   :  { %v889_v1 = vcombine.low %v863_v63, %v864_v61  ;;  %1208 = vmatprep.subr.mxu1 %v872_v12 }
 0x398   :  { %v903_v4 = vrot.slane %v889_v1, %v1476_v17 }
 0x44e   :  { %v616_v53 = vpop.f32.mrf.mxu1 }
 0x44f   :  { %v620_v54 = vadd.f32 %v616_v53, %v546_v52 }
 0x450   :  { %v1174_v55 = vpop.f32.mrf.mxu1 }
 0x451   :  { %1237 = vtanh.f32 %v620_v54 }
 0x45e   :  { %v1238_v56 = vpop.eup %1237 }
 0x45f   :  { %623 = vst.msk [vmem:[#allocation3 + $0x8] sm:$0x3] %vm218_vm2, %v1238_v56  ;;  %1184 = vmatmul.mubr.msk.f32.vlgmr.msra.gmra.mxu0 %vm92_vm1, %v1238_v56 }
 0x460   :  { %1198 = vmatpush3.msra.mxu0 %v1434_v5  ;;  %1205 = vmatprep.mubr.msk.f32.mxu0 %vm1368_vm0, %v1367_v0  ;;  %v896_v5 = vrot.slane %v888_v3, %v1476_v17 }
 0x461   :  { %1199 = vmatprep.subr.mxu0 %v1367_v0 }
 0x462   :  { %1200 = vmatpush3.msra.mxu0 %v1436_v6  ;;  %v904_v7 = vcombine.low %v896_v5, %v903_v4 }
 0x463   :  { %1201 = vmatprep.subr.mxu0 %v1367_v0 }
 0x464   :  { %1202 = vmatpush3.msra.mxu0 %v1440_v8 }
 0x465   :  { %1203 = vmatprep.subr.mxu0 %v1367_v0  ;;  %v704_v0 = vld [vmem:[#allocation2 + $0xc] sm:$0x3] }
 0x466   :  { %1204 = vmatpush3.msra.mxu0 %v1444_v10  ;;  %v865_v23 = vld [vmem:[#allocation3 + $0x8] sm:$0x3] }
 0x51f   :  { %v695_v58 = vpop.f32.mrf.mxu0 }
 0x520   :  { %v699_v59 = vadd.f32 %v695_v58, %v625_v57 }
 0x521   :  { %v1185_v60 = vpop.f32.mrf.mxu0 }
 0x522   :  { %1239 = vtanh.f32 %v699_v59 }
 0x52f   :  { %v1240_v6 = vpop.eup %1239 }
 0x530   :  { %702 = vst.msk [vmem:[#allocation3 + $0xa] sm:$0x3] %vm218_vm2, %v1240_v6  ;;  %1195 = vmatmul.mubr.msk.f32.vlgmr.msra.gmra.mxu1 %vm92_vm1, %v1240_v6 }
 0x531   :  { %1216 = vmatprep.mubr.msk.f32.mxu1 %vm92_vm1, %v904_v7  ;;  %1209 = vmatpush3.msra.mxu1 %v872_v12 }
 0x532   :  { %1210 = vmatprep.subr.mxu1 %v871_v13 }
 0x533   :  { %1211 = vmatpush3.msra.mxu1 %v871_v13 }
 0x534   :  { %1212 = vmatprep.subr.mxu1 %v870_v14 }
 0x535   :  { %1213 = vmatpush3.msra.mxu1 %v870_v14 }
 0x536   :  { %1214 = vmatprep.subr.mxu1 %v869_v15 }
 0x537   :  { %1215 = vmatpush3.msra.mxu1 %v869_v15  ;;  %v866_v22 = vld [vmem:[#allocation3 + $0xa] sm:$0x3] }
 0x538   :  { %v905_v24 = vcombine.low %v865_v23, %v866_v22 }
 0x53a   :  { %v913_v28 = vrot.slane %v905_v24, %v1476_v17 }
 0x5f0   :  { %v774_v8 = vpop.f32.mrf.mxu1 }
 0x5f1   :  { %v778_v9 = vadd.f32 %v774_v8, %v704_v0 }
 0x5f2   :  { %v1196_v10 = vpop.f32.mrf.mxu1 }
 0x5f3   :  { %1241 = vtanh.f32 %v778_v9 }
 0x600   :  { %v1242_v11 = vpop.eup %1241 }
 0x601   :  { %781 = vst.msk [vmem:[#allocation3 + $0xc] sm:$0x3] %vm218_vm2, %v1242_v11  ;;  %1206 = vmatmul.mubr.msk.f32.vlgmr.msra.gmra.mxu0 %vm92_vm1, %v1242_v11 }
 0x608   :  { %v867_v25 = vld [vmem:[#allocation3 + $0xc] sm:$0x3] }
 0x6c1   :  { %v853_v18 = vpop.f32.mrf.mxu0 }
 0x6c2   :  { %v857_v19 = vadd.f32 %v853_v18, %v783_v16 }
 0x6c3   :  { %v1207_v20 = vpop.f32.mrf.mxu0 }
 0x6c4   :  { %1243 = vtanh.f32 %v857_v19 }
 0x6d1   :  { %v1244_v21 = vpop.eup %1243 }
 0x6d2   :  { %860 = vst.msk [vmem:[#allocation3 + $0xe] sm:$0x3] %vm218_vm2, %v1244_v21 }
 0x6d9   :  { %v868_v26 = vld [vmem:[#allocation3 + $0xe] sm:$0x3] }
 0x6da   :  { %v906_v27 = vcombine.low %v867_v25, %v868_v26 }
 0x6dc   :  { %v920_v29 = vrot.slane %v906_v27, %v1476_v17 }
 0x6de   :  { %v921_v30 = vcombine.low %v913_v28, %v920_v29 }
 0x6e0   :  { %1217 = vmatmul.mubr.msk.f32.vlgmr.msra.gmra.mxu1 %vm92_vm1, %v921_v30 }
 0x7a0   :  { %v1218_v31 = vpop.f32.mrf.mxu1 }
 0x7a1   :  { %v998_v35 = vadd.f32 %v1218_v31, %v1054_v32 }
 0x7a2   :  { %v992_v33 = vpop.f32.mrf.mxu1 }
 0x7a3   :  { %v993_v34 = vadd.f32 %v1054_v32, %v992_v33 }
 0x7a5   :  { %1001 = vmax.xlane.f32.xlu0 %v993_v34 }
 0x7a9   :  { %1003 = vmax.xlane.f32.xlu0 %v998_v35 }
 0x82e   :  { %v1002_v36 = vpop.xlane.xlu0 %1001 }
 0x82f   :  { %v1005_v37 = vsub.f32 %v993_v34, %v1002_v36 }
 0x831   :  { %v1007_v38 = vmul.f32 1.442695, %v1005_v37 }
 0x832   :  { %v1004_v39 = vpop.xlane.xlu0 %1003 }
 0x833   :  { %1245 = vpow2.f32 %v1007_v38  ;;  %v1006_v40 = vsub.f32 %v998_v35, %v1004_v39 }
 0x835   :  { %v1009_v17 = vmul.f32 1.442695, %v1006_v40 }
 0x837   :  { %1247 = vpow2.f32 %v1009_v17 }
 0x840   :  { %v1246_v41 = vpop.eup %1245 }
 0x841   :  { %1011 = vadd.xlane.f32.xlu1 %v1246_v41 }
 0x844   :  { %v1248_v42 = vpop.eup %1247 }
 0x845   :  { %1013 = vadd.xlane.f32.xlu1 %v1248_v42 }
 0x8ca   :  { %v1012_v43 = vpop.xlane.xlu1 %1011 }
 0x8cb   :  { %1249 = vlog2.f32 %v1012_v43 }
 0x8ce   :  { %v1014_v44 = vpop.xlane.xlu1 %1013 }
 0x8cf   :  { %1251 = vlog2.f32 %v1014_v44 }
 0x8d8   :  { %v1250_v45 = vpop.eup %1249 }
 0x8d9   :  { %v1016_v46 = vmul.f32 0.6931472, %v1250_v45 }
 0x8db   :  { %v1019_v47 = vadd.f32 %v1016_v46, %v1002_v36 }
 0x8dc   :  { %v1252_v48 = vpop.eup %1251 }
 0x8dd   :  { %v1018_v49 = vmul.f32 0.6931472, %v1252_v48  ;;  %v1021_v50 = vsub.f32 %v993_v34, %v1019_v47 }
 0x8df   :  { %v1020_v51 = vadd.f32 %v1018_v49, %v1004_v39  ;;  %1023 = vst [vmem:[#allocation12] sm:$0xff] %v1021_v50 }
 0x8e1   :  { %v1022_v52 = vsub.f32 %v998_v35, %v1020_v51 }
 0x8e3   :  { %1024 = vst [vmem:[#allocation12 + $0x8] sm:$0xff] %v1022_v52 }
 0x8e4   :  { %1344 = shalt.err (!%p1341_p10)
}
 0x8e5   :  { %1036 = dma.vmem_to_hbm [thread:$0]  %s1031_s18, 256, %s1574_s6, [#allocation6], %s1363_s26, %s1363_s26, %s1364_s27  }
 0x8e6   :  { %1359 = dma.done.wait [#allocation6], 256  }
 0x8e7   :  { %1360 = vsyncadd [#allocation6], 4294967040 }
 0x8e8   :  { %1040 = vsyncpa [#allocation5], 1 }
 0x8e9   :  { %1041 = vsyncpa [#allocation8], 1 }
 0x8ea   :  { %1042 = vsyncpa [#allocation11], 1 }
 0x8eb   :  { %1043 = vsyncpa [#allocation6], 1 }

</bundles_post_ra>
